<compile_context>
chip_gen: v7x
topology: tpu7x:2x2x1
jax: 0.10.0
libtpu: 0.0.40
codegen_flags: <defaults>
</compile_context>

<pallas_src>
import functools

import jax
import jax.numpy as jnp
from jax.experimental import pallas as pl
from jax.experimental.pallas import tpu as pltpu


def _round_up(x, m):
    return ((x + m - 1) // m) * m


def _linear_kernel(x_ref, w_ref, b_ref, o_ref):
    # x_ref: (TM, D), w_ref: (D, Hp), b_ref: (1, Hp), o_ref: (TM, Hp)
    acc = jnp.dot(x_ref[...], w_ref[...], preferred_element_type=jnp.float32)
    o_ref[...] = (acc + b_ref[...].astype(jnp.float32)).astype(o_ref.dtype)


def _vmem_budget_bytes():
    """Per-generation scoped VMEM budget for this kernel (with headroom)."""
    try:
        cap = pltpu.get_tpu_info().vmem_capacity_bytes
    except Exception:  # query unavailable: assume the tightest part (v7x, 64 MiB)
        cap = 64 << 20
    # ~30% headroom for compiler scratch / semaphores / extra buffering; cap the
    # 128 MiB parts (v5e/v6e) at a 64 MiB scoped budget.
    return min(int(cap * 0.7), 64 << 20)


def pallas_linear(x2d, w, b, *, force_pallas=False, compute_dtype=None,
                  max_tm=2048, lane=128, min_grid_steps=4):
    """y = x2d @ w + b via a Pallas TPU kernel.

    x2d: (M, D), w: (D, H), b: (H,) -> (M, H).
    """
    M, D = x2d.shape
    Dw, H = w.shape
    assert Dw == D and b.shape == (H,)
    out_dtype = x2d.dtype

    # Small-problem fallback: fixed kernel-launch + DMA-setup cost dwarfs the work.
    if not force_pallas and 4 * (M * D + D * H + M * H) < (1 << 20):
        return (x2d @ w + b[None, :]).astype(out_dtype)

    # --- Output lane dim: only pad H when it is >= one lane and misaligned.
    #     For H < 128 a (TM, H) block (full array dim) is legal; masked stores
    #     beat 4x output-write amplification + an extra HBM pass for slicing.
    if H % lane == 0 or H < lane:
        Hp, w_p, b_p = H, w, b
    else:
        Hp = _round_up(H, lane)
        w_p = jnp.zeros((D, Hp), w.dtype).at[:, :H].set(w)
        b_p = jnp.zeros((Hp,), b.dtype).at[:H].set(b)
    b_p = b_p.reshape(1, Hp)

    # Optional bf16 inputs (halves HBM bytes, ~3x MXU rate); accumulate in f32.
    if compute_dtype is not None:
        x2d = x2d.astype(compute_dtype)
        w_p = w_p.astype(compute_dtype)
    in_bytes = jnp.dtype(x2d.dtype).itemsize
    out_bytes = jnp.dtype(out_dtype).itemsize

    # --- M tile: small enough that the grid has >= min_grid_steps steps (so the
    #     pipeline can prefetch tile i+1 while computing i and both v7x TCs get
    #     work), large enough to amortize per-step overhead, and shrunk until the
    #     double-buffered x/out tiles + resident W/b fit the per-gen VMEM budget.
    budget = _vmem_budget_bytes()
    TM = min(max_tm, _round_up(max(pl.cdiv(M, min_grid_steps), 8), 8))

    def vmem_need(tm):
        return (2 * tm * (D * in_bytes + Hp * out_bytes)  # double-buffered x/out tiles
                + D * Hp * in_bytes                       # resident weight (single-buffered)
                + Hp * 4)                                 # resident bias

    while TM > 8 and vmem_need(TM) > budget:
        TM = max(8, _round_up(TM // 2, 8))

    Mp = _round_up(M, TM)
    x_p = x2d if Mp == M else jnp.pad(x2d, ((0, Mp - M), (0, 0)))
    grid = (Mp // TM,)
    vmem_limit = int(min(budget, max(2 * vmem_need(TM), 4 << 20)))

    out = pl.pallas_call(
        _linear_kernel,
        out_shape=jax.ShapeDtypeStruct((Mp, Hp), out_dtype),
        grid_spec=pltpu.PrefetchScalarGridSpec(
            num_scalar_prefetch=0,
            grid=grid,
            in_specs=[
                # Activations: streamed over M (default double-buffered pipeline).
                pl.BlockSpec((TM, D), lambda i: (i, 0)),
                # Weights / bias: constant index_map -> resident; single-buffer
                # them so they do not pay 2x VMEM for nothing.
                pl.BlockSpec((D, Hp), lambda i: (0, 0), pipeline_mode=pl.Buffered(1)),
                pl.BlockSpec((1, Hp), lambda i: (0, 0), pipeline_mode=pl.Buffered(1)),
            ],
            out_specs=pl.BlockSpec((TM, Hp), lambda i: (i, 0)),
        ),
        compiler_params=pltpu.CompilerParams(
            dimension_semantics=("parallel",),        # independent M tiles (v7x 2 TCs)
            vmem_limit_bytes=vmem_limit,
            allow_input_fusion=[True, False, False],  # let XLA fuse patchify into x
        ),
        cost_estimate=pl.CostEstimate(
            flops=2 * M * D * H,
            transcendentals=0,
            bytes_accessed=(Mp * D + D * Hp) * in_bytes + (Mp * Hp + Hp) * out_bytes,
        ),
    )(x_p, w_p, b_p)

    if Mp != M:
        out = out[:M]
    if Hp != H:
        out = out[:, :H]
    return out


def custom_reshape_layer(x, w, b, patch_size, *, force_pallas=False, compute_dtype=None):
    """Reproduces CustomReshapeLayer.forward: (B,C,H,W) -> (B, num_patches, hidden)."""
    B, C, H, W = x.shape
    p = patch_size
    Gh, Gw = H // p, W // p
    num_patches = Gh * Gw
    D = C * p * p

    # torch: x.unfold(2,p,p).unfold(3,p,p) -> (B, C, Gh, Gw, p, p);
    # .contiguous().view(B, num_patches, -1) is a raw row-major reinterpretation
    # of the (C, Gh, Gw, p, p) block — identical to this reshape/transpose/reshape.
    x_unf = x.reshape(B, C, Gh, p, Gw, p).transpose(0, 1, 2, 4, 3, 5)
    patches = x_unf.reshape(B * num_patches, D)

    out2d = pallas_linear(patches, w, b, force_pallas=force_pallas,
                          compute_dtype=compute_dtype)
    return out2d.reshape(B, num_patches, -1)


if __name__ == "__main__":
    # Small shapes consistent with the module.
    batch = 2
    channels = 4
    image_size = 16
    patch_size = 4
    hidden_size = 32

    num_patches = (image_size // patch_size) ** 2          # 16
    in_features = channels * patch_size * patch_size       # 64

    key = jax.random.PRNGKey(0)
    kx, kw, kb = jax.random.split(key, 3)
    x = jax.random.normal(
        kx, (batch, channels, image_size, image_size), dtype=jnp.float32
    )
    # TODO(synk): the PyTorch module builds nn.Linear *inside* forward with fresh
    # random weights each call; here we use deterministic Linear-style init once.
    bound = 1.0 / jnp.sqrt(in_features)
    w = jax.random.uniform(kw, (in_features, hidden_size), jnp.float32, -bound, bound)
    b = jax.random.uniform(kb, (hidden_size,), jnp.float32, -bound, bound)

    # force_pallas=True: at these toy shapes the auto-heuristic would (correctly)
    # fall back to plain JAX; force the kernel path so the Pallas kernel is run.
    fwd = jax.jit(functools.partial(custom_reshape_layer, patch_size=patch_size,
                                    force_pallas=True))
    out = jax.block_until_ready(fwd(x, w, b))

    # Reference: same patchify + plain-JAX Linear.
    x_unf = x.reshape(
        batch, channels, image_size // patch_size, patch_size,
        image_size // patch_size, patch_size
    ).transpose(0, 1, 2, 4, 3, 5)
    patches = x_unf.reshape(batch, num_patches, in_features)
    expected = patches @ w + b

    assert out.shape == (batch, num_patches, hidden_size)
    assert jnp.allclose(out, expected, atol=1e-5, rtol=1e-5)

    print("KERNEL_OK")
</pallas_src>

<mosaic_0001>
module attributes {stable_mosaic.version = 11 : i64} {
  func.func @_linear_kernel(%arg0: i32, %arg1: memref<8x64xf32, #tpu.memory_space<vmem>>, %arg2: memref<64x32xf32, #tpu.memory_space<vmem>>, %arg3: memref<1x32xf32, #tpu.memory_space<vmem>>, %arg4: memref<8x32xf32, #tpu.memory_space<vmem>>) attributes {dimension_semantics = [#tpu.dimension_semantics<parallel>], iteration_bounds = array<i64: 4>, scalar_prefetch = 0 : i64, scratch_operands = 0 : i64, tpu.core_type = #tpu.core_type<tc>, window_params = [{transform_indices = @transform_0, window_bounds = array<i64: 8, 64>}, {pipeline_mode = #tpu.pipeline_mode<synchronous>, transform_indices = @transform_1, window_bounds = array<i64: 64, 32>}, {pipeline_mode = #tpu.pipeline_mode<synchronous>, transform_indices = @transform_2, window_bounds = array<i64: 1, 32>}, {transform_indices = @transform_3, window_bounds = array<i64: 8, 32>}]} {
    %c0 = arith.constant 0 : index
    %c0_0 = arith.constant 0 : index
    %0 = vector.load %arg1[%c0, %c0_0] : memref<8x64xf32, #tpu.memory_space<vmem>>, vector<8x64xf32>
    %c0_1 = arith.constant 0 : index
    %c0_2 = arith.constant 0 : index
    %1 = vector.load %arg2[%c0_1, %c0_2] : memref<64x32xf32, #tpu.memory_space<vmem>>, vector<64x32xf32>
    %cst = arith.constant dense<0.000000e+00> : vector<8x32xf32>
    %2 = tpu.matmul %0, %1, %cst {dimension_numbers = #tpu.dot_dimension_numbers<[1], [0], [0], [1], [0, 0, 1, 1], [], []>} : vector<8x64xf32>, vector<64x32xf32>, vector<8x32xf32> -> vector<8x32xf32>
    %c0_3 = arith.constant 0 : index
    %c0_4 = arith.constant 0 : index
    %3 = vector.load %arg3[%c0_3, %c0_4] : memref<1x32xf32, #tpu.memory_space<vmem>>, vector<1x32xf32>
    %4 = vector.broadcast %3 : vector<1x32xf32> to vector<8x32xf32>
    %5 = arith.addf %2, %4 : vector<8x32xf32>
    %c0_5 = arith.constant 0 : index
    %c0_6 = arith.constant 0 : index
    %6 = vector.load %arg4[%c0_5, %c0_6] : memref<8x32xf32, #tpu.memory_space<vmem>>, vector<8x32xf32>
    tpu.vector_store %arg4[%c0_5, %c0_6], %5 {strides = array<i32>} : memref<8x32xf32, #tpu.memory_space<vmem>>, vector<8x32xf32>,
    return
  }
  func.func @transform_0(%arg0: i32) -> (i32, i32) {
    %c0_i32 = arith.constant 0 : i32
    %c0_i32_0 = arith.constant 0 : i32
    return %arg0, %c0_i32 : i32, i32
  }
  func.func @transform_1(%arg0: i32) -> (i32, i32) {
    %c0_i32 = arith.constant 0 : i32
    %c0_i32_0 = arith.constant 0 : i32
    %c0_i32_1 = arith.constant 0 : i32
    return %c0_i32, %c0_i32_0 : i32, i32
  }
  func.func @transform_2(%arg0: i32) -> (i32, i32) {
    %c0_i32 = arith.constant 0 : i32
    %c0_i32_0 = arith.constant 0 : i32
    %c0_i32_1 = arith.constant 0 : i32
    return %c0_i32, %c0_i32_0 : i32, i32
  }
  func.func @transform_3(%arg0: i32) -> (i32, i32) {
    %c0_i32 = arith.constant 0 : i32
    %c0_i32_0 = arith.constant 0 : i32
    return %arg0, %c0_i32 : i32, i32
  }
}

</mosaic_0001>

<bundles_post_ra>
// kernel: custom_reshape_layer.1
= control target key start
LH: loop header
LB: loop body
LE: loop exit
PB: predicated region body
PF: predicated region fallthrough
CT: control target
= control target key end

     0   :  { %8 = vsyncpa [#allocation3], 0  ;;  %s640_s0 = inlined_call_operand.vmem [shape: f32[32,64], index: 0, kind: input, shape index: {}]   ;;  %s641_s1 = inlined_call_operand.vmem [shape: f32[64,32], index: 1, kind: input, shape index: {}]   ;;  %s642_s2 = inlined_call_operand.vmem [shape: f32[1,32], index: 2, kind: input, shape index: {}]   ;;  %s643_s3 = inlined_call_operand.hbm [shape: f32[32,32], index: 3, kind: output, shape index: {}]  }
   0x1   :  { %10 = vsyncpa [#allocation3 + $0x1], 0  ;;  %s513_s12 = smov 0   ;;  %s515_s13 = smov 0  }
   0x2   :  { %s517_s14 = smov 0   ;;  %s519_s15 = smov 0  }
   0x3 LB: > { %s534_s16 = sadd.s32 4294967295, %s487_s15   ;;  %s331_s17 = sadd.s32 4294967294, %s487_s15   ;;  %s487_s15 = sphi %s519_s15, %s649_s15   ;;  %s483_s14 = sphi %s517_s14, %s648_s14   ;;  %s479_s13 = sphi %s515_s13, %s647_s13   ;;  %s475_s12 = sphi %s513_s12, %s646_s12  }
   0x4   : > { %s538_s18 = sadd.s32 1, %s487_s15   ;;  %s91_s19 = sadd.s32 1, %s483_s14 }
   0x5   : > { %s88_s20 = ssub.s32 %s487_s15, %s538_s18  ;;  %p101_p0 = scmp.ne.s32.totalorder %s483_s14, %s479_s13 }
   0x6   : > { %p89_p1 = scmp.eq.s32.totalorder %s88_s20, 0  ;;  %p102_p2 = scmp.eq.s32.totalorder %s534_s16, 3 }
   0x7   : > { %p107_p3 = scmp.ne.s32.totalorder %s479_s13, %s475_s12  ;;  %p108_p4 = scmp.eq.s32.totalorder %s331_s17, 3 }
   0x8   : > { %s549_s21 = scalar_select %p89_p1, %s483_s14, %s91_s19  }
   0x9   : > { %p551_p5 = por %p102_p2, %p101_p0  ;;  %p555_p6 = por %p108_p4, %p107_p3 }
   0xa   : > { %p334_p7 = scmp.ge.s32.totalorder %s487_s15, 1  ;;  %p139_p8 = scmp.lt.s32.totalorder %s487_s15, 5 }
   0xc   : > { %p140_p9 = pnand %p334_p7, %p139_p8 }
   0xd   : > { %v167_v0 = vld [vmem:[%s641_s1] sm:$0xff] (!%p140_p9)  ;;  %v168_v1 = vld [vmem:[%s641_s1 + $0x8] sm:$0xff] (!%p140_p9)  ;;  %v169_v2 = vld [vmem:[%s641_s1 + $0x10] sm:$0xff] (!%p140_p9)  ;;  %v489_v3 = vmov (!%p140_p9), 0.0|0.0   ;;  %vm490_vm0 = vmmov (!%p140_p9), 0   ;;  %v491_v6 = vmov (!%p140_p9), 0.0  }
   0xe   : > { %143 = sbr.rel (%p140_p9) target bundleno = 259 (0x103), region = 32  ;;  %371 = vmatprep.subr.bf16.mxu0 (!%p140_p9), %v489_v3  ;;  %v372_v4 = vpack.c.bf16 (!%p140_p9), %v168_v1, %v167_v0  ;;  %v170_v5 = vld [vmem:[%s641_s1 + $0x18] sm:$0xff] (!%p140_p9)  ;;  %368 = vmatprep.mubr.msk.f32.mxu0 (!%p140_p9), %vm490_vm0, %v491_v6  ;;  %p162_p10 = scmp.lt.s32.totalorder (!%p140_p9), %s534_s16, 3  ;;  %v171_v8 = vld [vmem:[%s641_s1 + $0x20] sm:$0xff] (!%p140_p9)  ;;  %v172_v9 = vld [vmem:[%s641_s1 + $0x28] sm:$0xff] (!%p140_p9)  ;;  %vm182_vm1 = vcmask (!%p140_p9), 523264  }
   0xf   : > { %v375_v7 = vpack.c.bf16 (!%p140_p9), %v170_v5, %v169_v2  ;;  %v378_v10 = vpack.c.bf16 (!%p140_p9), %v172_v9, %v171_v8  ;;  %v173_v11 = vld [vmem:[%s641_s1 + $0x30] sm:$0xff] (!%p140_p9)  ;;  %v174_v12 = vld [vmem:[%s641_s1 + $0x38] sm:$0xff] (!%p140_p9)  ;;  %s159_s27 = sand.u32 (!%p140_p9), 1, %s479_s13   ;;  %v337_v15 = vld [vmem:[%s642_s2] ss:$0 sm:$0xff] (!%p140_p9)  ;;  %s340_s4 = sshll.u32 (!%p140_p9), %s534_s16, 7 }
  0x10   : > { %373 = vmatpush3.bf16.msra.mxu0 (!%p140_p9), %v372_v4  ;;  %v381_v13 = vpack.c.bf16 (!%p140_p9), %v174_v12, %v173_v11  ;;  %s335_s28 = sshll.u32 (!%p140_p9), %s159_s27, 3  ;;  %vm256_vm2 = vcmask (!%p140_p9), 261120   ;;  %s259_s10 = scalar_lea.sflag (!%p140_p9), [#allocation3], %s159_s27 }
  0x11   : > { %374 = vmatprep.subr.bf16.mxu0 (!%p140_p9), %v489_v3  ;;  %s161_s5 = scalar_lea.vmem (!%p140_p9), [#allocation2], %s335_s28 }
  0x12   : > { %s272_s6 = sshll.u32 (!%p140_p9), %s161_s5, 4  ;;  %s600_s6 = int_to_ptr.vmem [resolvable:$true] %s272_s6 }
  0x13   : > { %s425_s11 = scalar_lea.vmem (!%p140_p9), %s600_s6, 128 }
  0x14   : > { %376 = vmatpush3.bf16.msra.mxu0 (!%p140_p9), %v375_v7  ;;  %p426_p11 = scmp.ne.s32.totalorder (!%p140_p9), %s600_s6, %s425_s11 }
  0x15   : > { %s163_s9 = scalar_select %p162_p10, %s534_s16, 3  ;;  %377 = vmatprep.subr.bf16.mxu0 %v489_v3 }
  0x16   : > { %p427_p12 = pnand %p426_p11, %p551_p5  ;;  %s492_s16 = smov [#allocation2]  }
  0x17   : > { %s336_s20 = sshll.u32 %s163_s9, 3  ;;  %s598_s9 = scalar_lea.hbm %s643_s3, %s340_s4 }
  0x18   : > { %379 = vmatpush3.bf16.msra.mxu0 %v378_v10  ;;  %s165_s26 = scalar_lea.vmem %s640_s0, %s336_s20  ;;  %p428_p13 = pneg %p427_p12 }
  0x19   : > { %380 = vmatprep.subr.bf16.mxu0 %v489_v3  ;;  %v166_v14 = vld [vmem:[%s165_s26] sm:$0xff]  ;;  %s429_s17 = sshll.u32 %s492_s16, 4  ;;  %s430_s17 = int_to_ptr.vmem [resolvable:$false] %s429_s17 }
  0x1a   : > { %s431_s19 = scalar_lea.vmem %s430_s17, 256  ;;  %p432_p0 = scmp.lt.s32.totalorder %s600_s6, %s430_s17 }
  0x1b   : > { %p433_p1 = scmp.lt.s32.totalorder %s431_s19, %s425_s11 }
  0x1c   : > { %382 = vmatpush3.bf16.msra.mxu0 %v381_v13 }
  0x1d   : > { %p434_p2 = por %p433_p1, %p432_p0 }
  0x1f   : > { %369 = vmatmul.mubr.msk.f32.vlgmr.msra.gmra.mrb[0].mxu0 %vm182_vm1, %v166_v14  ;;  %p435_p3 = pnand %p434_p2, %p428_p13 }
  0xf2   : > { %v252_v16 = vpop.f32.mrb[0].mxu0 }
  0xf3   : > { %v253_v17 = vadd.f32 %v337_v15, %v252_v16  ;;  %v370_v18 = vpop.f32.mrb[1].mxu0 }
  0xf5   : > { %257 = vst.msk [vmem:[%s161_s5] sm:$0xff] %vm256_vm2, %v253_v17 }
  0xf6   : > { %438 = shalt.err (!%p435_p3)
}
  0xf7   : > { %s439_s20 = scalar_lea.hbm %s598_s9, 128  ;;  %s443_s26 = scalar_lea.hbm %s643_s3, 512 }
  0xf8   : > { %p440_p4 = scmp.ne.s32.totalorder %s598_s9, %s439_s20  ;;  %p444_p9 = scmp.lt.u32.totalorder %s598_s9, %s643_s3 }
  0xf9   : > { %p445_p10 = scmp.lt.u32.totalorder %s443_s26, %s439_s20  ;;  %p447_p12 = scmp.lt.u32.totalorder %s439_s20, %s598_s9 }
  0xfa   : > { %p441_p7 = pnand %p440_p4, %p551_p5 }
  0xfb   : > { %p446_p11 = por %p445_p10, %p444_p9 }
  0xfc   : > { %p442_p8 = pneg %p441_p7 }
  0xfd   : > { %p448_p13 = por %p447_p12, %p446_p11 }
  0xff   : > { %p449_p0 = pnand %p448_p13, %p442_p8 }
 0x101   : > { %452 = shalt.err (!%p449_p0)
}
 0x102   : > { %383 = dma.vmem_to_hbm [thread:$0]  (%p551_p5), %s600_s6, 128, %s598_s9, %s259_s10  }
 0x103 PF: > { %p389_p1 = scmp.ge.s32.totalorder %s487_s15, 2  ;;  %s284_s29 = sand.u32 1, %s475_s12  }
 0x104   : > { %s285_s30 = scalar_lea.sflag [#allocation3], %s284_s29 }
 0x105   : > { %p386_p2 = pnand %p389_p1, %p555_p6 }
 0x107   : > { %470 = dma.done.wait (!%p386_p2), %s285_s30, 128  }
 0x108   : > { %472 = vsyncadd (!%p386_p2), %s285_s30, 4294967168  ;;  %p13_p3 = scmp.ge.s32.totalorder %s538_s18, 6   ;;  %s646_s12 = smov %s479_s13 }
 0x109   : > { %s647_s13 = smov %s483_s14  ;;  %s648_s14 = smov %s549_s21 }
 0x10a   : > { %s649_s15 = smov %s538_s18  ;;  %15 = sbr.rel (!%p13_p3) target bundleno = 3 (0x3), region = 67 }
 0x111   :  { %290 = vsyncpa [#allocation3], 1 }
 0x112   :  { %292 = vsyncpa [#allocation3 + $0x1], 1 }

</bundles_post_ra>
